<compile_context>
chip_gen: v6e
topology: v6e:2x2x1
jax: 0.10.0
libtpu: 0.0.40
codegen_flags: <defaults>
</compile_context>

<pallas_src>
import jax
import jax.numpy as jnp
from jax.experimental import pallas as pl
from jax.experimental.pallas import tpu as pltpu


def _logreg_kernel(xt_ref, p_ref, o_ref):
    # xt_ref: (F, TB)   features on sublanes, batch lane-dense (streamed)
    # p_ref : (C, F+1)  resident params: columns 0..F-1 = W, column F = bias
    # o_ref : (C, TB)   classes on sublanes, batch lane-dense (streamed)
    f_dim = xt_ref.shape[0]          # static (=3)
    p = p_ref[...]                   # tiny resident block

    # Unrolled VPU broadcast-MAC over the K=3 contraction (no MXU push/pop).
    # x row f -> lane-dense (1, TB) sublane broadcast (near-free);
    # w column f / bias -> (C, 1) lane broadcast from the single param vreg.
    logits = p[:, f_dim:f_dim + 1] + p[:, 0:1] * xt_ref[0:1, :]
    for f in range(1, f_dim):        # static trip count -> unrolled FMAs
        logits = logits + p[:, f:f + 1] * xt_ref[f:f + 1, :]   # (C,1)*(1,TB)

    # Numerically stable softmax over classes (sublane axis): <=2-vreg
    # cross-sublane reduces per lane group.
    m = jnp.max(logits, axis=0, keepdims=True)      # (1, TB)
    e = jnp.exp(logits - m)                         # (C, TB)
    s = jnp.sum(e, axis=0, keepdims=True)           # (1, TB)
    r = pl.reciprocal(s, approx=True)               # EUP vrcp (free slot)
    r = r * (2.0 - s * r)                           # one Newton step -> ~f32
    o_ref[...] = (e * r).astype(o_ref.dtype)


def logistic_regression_forward(features, weight, bias, *, block_b=32768,
                                out_dtype=jnp.float32):
    """features: (B, 3) f32; weight: (C, 3) f32 (nn.Linear layout); bias: (C,) f32."""
    B, F = features.shape
    C = weight.shape[0]

    # One-time layout plumbing outside the kernel hot path:
    #   x -> (F, B) lane-dense, params -> (C, F+1) = [W | bias].
    x_t = features.T
    params = jnp.concatenate([weight, bias.reshape(C, 1)], axis=1)

    tb = min(block_b, B)
    # Keep >=2 grid steps for mid/large batches so v7x's second TensorCore
    # gets work from the "parallel" grid axis (no-op on v5e/v6e).
    if B > 1024 and tb >= B:
        tb = pl.cdiv(B, 2)
    if tb < B:
        tb = ((tb + 127) // 128) * 128      # lane-dense blocks: multiple of 128
        if tb >= B:
            tb = B
    grid = (pl.cdiv(B, tb),)

    out_t = pl.pallas_call(
        _logreg_kernel,
        out_shape=jax.ShapeDtypeStruct((C, B), out_dtype),
        grid=grid,
        in_specs=[
            pl.BlockSpec((F, tb), lambda i: (0, i)),        # streamed lane-dense x tile
            pl.BlockSpec((C, F + 1), lambda i: (0, 0)),     # resident packed params
        ],
        out_specs=pl.BlockSpec((C, tb), lambda i: (0, i)),  # lane-dense output tile
        compiler_params=pltpu.CompilerParams(
            dimension_semantics=("parallel",)),             # megacore-shardable
    )(x_t, params)

    return out_t.T                                          # back to (B, C)


def _reference(features, weight, bias):
    logits = features @ weight.T + bias
    return jax.nn.softmax(logits, axis=-1)


if __name__ == "__main__":
    key = jax.random.PRNGKey(0)
    k_x, k_w, k_b, k_x2, k_x3 = jax.random.split(key, 5)

    in_features = 3        # fixed by the module: Linear(3, possible_classes)
    possible_classes = 10
    B = 8                  # small batch (single grid step)

    # Deterministic init mimicking torch.nn.Linear's U(-1/sqrt(fan_in), 1/sqrt(fan_in)).
    bound = 1.0 / jnp.sqrt(jnp.float32(in_features))
    weight = jax.random.uniform(k_w, (possible_classes, in_features),
                                jnp.float32, -bound, bound)
    bias = jax.random.uniform(k_b, (possible_classes,), jnp.float32, -bound, bound)
    features = jax.random.normal(k_x, (B, in_features), jnp.float32)

    out = jax.block_until_ready(logistic_regression_forward(features, weight, bias))
    ref = _reference(features, weight, bias)
    assert out.shape == (B, possible_classes)
    assert jnp.allclose(out, ref, atol=1e-5, rtol=1e-5), "mismatch vs reference (B=8)"
    assert jnp.allclose(jnp.sum(out, axis=-1), 1.0, atol=1e-5), "rows must sum to 1"

    # Multi-step parallel grid (exact tile multiple).
    B2, TB2 = 256, 128
    features2 = jax.random.normal(k_x2, (B2, in_features), jnp.float32)
    out2 = jax.block_until_ready(
        logistic_regression_forward(features2, weight, bias, block_b=TB2))
    ref2 = _reference(features2, weight, bias)
    assert jnp.allclose(out2, ref2, atol=1e-5, rtol=1e-5), "mismatch vs reference (tiled)"
    assert jnp.allclose(jnp.sum(out2, axis=-1), 1.0, atol=1e-5), "rows must sum to 1 (tiled)"

    # Ragged last tile (B % tb != 0): padding lanes go through exp but the
    # masked output writeback discards them.
    B3, TB3 = 300, 128
    features3 = jax.random.normal(k_x3, (B3, in_features), jnp.float32)
    out3 = jax.block_until_ready(
        logistic_regression_forward(features3, weight, bias, block_b=TB3))
    ref3 = _reference(features3, weight, bias)
    assert jnp.allclose(out3, ref3, atol=1e-5, rtol=1e-5), "mismatch vs reference (ragged)"
    assert jnp.allclose(jnp.sum(out3, axis=-1), 1.0, atol=1e-5), "rows must sum to 1 (ragged)"

    print("KERNEL_OK")
</pallas_src>

<mosaic_0001>
module attributes {stable_mosaic.version = 11 : i64} {
  func.func @_logreg_kernel(%arg0: i32, %arg1: memref<3x8xf32, #tpu.memory_space<vmem>>, %arg2: memref<10x4xf32, #tpu.memory_space<vmem>>, %arg3: memref<10x8xf32, #tpu.memory_space<vmem>>) attributes {dimension_semantics = [#tpu.dimension_semantics<parallel>], iteration_bounds = array<i64: 1>, scalar_prefetch = 0 : i64, scratch_operands = 0 : i64, tpu.core_type = #tpu.core_type<tc>, window_params = [{transform_indices = @transform_0, window_bounds = array<i64: 3, 8>}, {pipeline_mode = #tpu.pipeline_mode<synchronous>, transform_indices = @transform_1, window_bounds = array<i64: 10, 4>}, {transform_indices = @transform_2, window_bounds = array<i64: 10, 8>}]} {
    %c0 = arith.constant 0 : index
    %c0_0 = arith.constant 0 : index
    %0 = vector.load %arg2[%c0, %c0_0] : memref<10x4xf32, #tpu.memory_space<vmem>>, vector<10x4xf32>
    %1 = vector.extract_strided_slice %0 {offsets = [0, 3], sizes = [10, 1], strides = [1, 1]} : vector<10x4xf32> to vector<10x1xf32>
    %2 = vector.extract_strided_slice %0 {offsets = [0, 0], sizes = [10, 1], strides = [1, 1]} : vector<10x4xf32> to vector<10x1xf32>
    %c0_1 = arith.constant 0 : index
    %c0_2 = arith.constant 0 : index
    %3 = vector.load %arg1[%c0_1, %c0_2] : memref<3x8xf32, #tpu.memory_space<vmem>>, vector<1x8xf32>
    %4 = vector.broadcast %2 : vector<10x1xf32> to vector<10x8xf32>
    %5 = vector.broadcast %3 : vector<1x8xf32> to vector<10x8xf32>
    %6 = arith.mulf %4, %5 : vector<10x8xf32>
    %7 = vector.broadcast %1 : vector<10x1xf32> to vector<10x8xf32>
    %8 = arith.addf %7, %6 : vector<10x8xf32>
    %9 = vector.extract_strided_slice %0 {offsets = [0, 1], sizes = [10, 1], strides = [1, 1]} : vector<10x4xf32> to vector<10x1xf32>
    %c1 = arith.constant 1 : index
    %c0_3 = arith.constant 0 : index
    %10 = vector.load %arg1[%c1, %c0_3] : memref<3x8xf32, #tpu.memory_space<vmem>>, vector<1x8xf32>
    %11 = vector.broadcast %9 : vector<10x1xf32> to vector<10x8xf32>
    %12 = vector.broadcast %10 : vector<1x8xf32> to vector<10x8xf32>
    %13 = arith.mulf %11, %12 : vector<10x8xf32>
    %14 = arith.addf %8, %13 : vector<10x8xf32>
    %15 = vector.extract_strided_slice %0 {offsets = [0, 2], sizes = [10, 1], strides = [1, 1]} : vector<10x4xf32> to vector<10x1xf32>
    %c2 = arith.constant 2 : index
    %c0_4 = arith.constant 0 : index
    %16 = vector.load %arg1[%c2, %c0_4] : memref<3x8xf32, #tpu.memory_space<vmem>>, vector<1x8xf32>
    %17 = vector.broadcast %15 : vector<10x1xf32> to vector<10x8xf32>
    %18 = vector.broadcast %16 : vector<1x8xf32> to vector<10x8xf32>
    %19 = arith.mulf %17, %18 : vector<10x8xf32>
    %20 = arith.addf %14, %19 : vector<10x8xf32>
    %cst = arith.constant dense<0xFF800000> : vector<8xf32>
    %21 = vector.multi_reduction <maximumf>, %20, %cst [0] : vector<10x8xf32> to vector<8xf32>
    %22 = vector.shape_cast %21 : vector<8xf32> to vector<1x8xf32>
    %23 = vector.broadcast %22 : vector<1x8xf32> to vector<10x8xf32>
    %24 = arith.subf %20, %23 : vector<10x8xf32>
    %25 = math.exp %24 : vector<10x8xf32>
    %cst_5 = arith.constant dense<0.000000e+00> : vector<8xf32>
    %26 = vector.multi_reduction <add>, %25, %cst_5 [0] : vector<10x8xf32> to vector<8xf32>
    %27 = vector.shape_cast %26 : vector<8xf32> to vector<1x8xf32>
    %28 = tpu.reciprocal %27 {approx = true} : vector<1x8xf32> -> vector<1x8xf32>
    %29 = arith.mulf %27, %28 : vector<1x8xf32>
    %cst_6 = arith.constant 2.000000e+00 : f32
    %30 = vector.broadcast %cst_6 : f32 to vector<1x8xf32>
    %31 = arith.subf %30, %29 : vector<1x8xf32>
    %32 = arith.mulf %28, %31 : vector<1x8xf32>
    %33 = vector.broadcast %32 : vector<1x8xf32> to vector<10x8xf32>
    %34 = arith.mulf %25, %33 : vector<10x8xf32>
    %c0_7 = arith.constant 0 : index
    %c0_8 = arith.constant 0 : index
    %35 = vector.load %arg3[%c0_7, %c0_8] : memref<10x8xf32, #tpu.memory_space<vmem>>, vector<10x8xf32>
    tpu.vector_store %arg3[%c0_7, %c0_8], %34 {strides = array<i32>} : memref<10x8xf32, #tpu.memory_space<vmem>>, vector<10x8xf32>,
    return
  }
  func.func @transform_0(%arg0: i32) -> (i32, i32) {
    %c0_i32 = arith.constant 0 : i32
    %c0_i32_0 = arith.constant 0 : i32
    return %c0_i32, %arg0 : i32, i32
  }
  func.func @transform_1(%arg0: i32) -> (i32, i32) {
    %c0_i32 = arith.constant 0 : i32
    %c0_i32_0 = arith.constant 0 : i32
    %c0_i32_1 = arith.constant 0 : i32
    return %c0_i32, %c0_i32_0 : i32, i32
  }
  func.func @transform_2(%arg0: i32) -> (i32, i32) {
    %c0_i32 = arith.constant 0 : i32
    %c0_i32_0 = arith.constant 0 : i32
    return %c0_i32, %arg0 : i32, i32
  }
}

</mosaic_0001>

<bundles_post_ra>
// kernel: tpu_custom_call.1
= control target key start
LH: loop header
LB: loop body
LE: loop exit
PB: predicated region body
PF: predicated region fallthrough
CT: control target
= control target key end

     0   :  { %v131_v0 = vmov 3   ;;  %v132_v1 = vmov 0   ;;  %v133_v4 = vmov 1   ;;  %v134_v5 = vmov 2   ;;  %s177_s1 = inlined_call_operand.vmem [shape: f32[10,4], index: 1, kind: input, shape index: {}]   ;;  %s178_s0 = inlined_call_operand.vmem [shape: f32[3,8], index: 0, kind: input, shape index: {}]   ;;  %s179_s2 = inlined_call_operand.vmem [shape: f32[10,8], index: 2, kind: output, shape index: {}]  }
   0x1   :  { %120 = vset.pattern.permute.xlu1 %v131_v0  ;;  %119 = vset.pattern.permute.xlu0 %v132_v1  ;;  %v11_v2 = vld [vmem:[%s177_s1] sm:$0xff]  ;;  %v12_v3 = vld [vmem:[%s177_s1 + $0x8] sm:$0x3]  ;;  %vm74_vm0 = vcmask 64512   ;;  %vm76_vm1 = vcmask 58368  }
   0x2   :  { %31 = vperm.xlu1 %120, %v11_v2   ;;  %16 = vperm.xlu0 %119, %v11_v2   ;;  %v112_v10 = vld [vmem:[%s178_s0] ss:$0 sm:$0xff]  ;;  %v113_v11 = vld [vmem:[%s178_s0 + $0x1] ss:$0 sm:$0xff]  ;;  %v114_v18 = vld [vmem:[%s178_s0 + $0x2] ss:$0 sm:$0xff] }
   0x6   :  { %35 = vperm.xlu1 %120, %v12_v3   ;;  %21 = vperm.xlu0 %119, %v12_v3  }
   0xa   :  { %122 = vset.pattern.permute.xlu1 %v133_v4  ;;  %121 = vset.pattern.permute.xlu0 %v133_v4 }
   0xb   :  { %46 = vperm.xlu1 %122, %v12_v3   ;;  %42 = vperm.xlu0 %121, %v11_v2  }
   0xf   :  { %123 = vset.pattern.permute.xlu1 %v134_v5  ;;  %124 = vset.pattern.permute.xlu0 %v134_v5 }
  0x10   :  { %59 = vperm.xlu1 %123, %v11_v2   ;;  %63 = vperm.xlu0 %124, %v12_v3  }
  0x7d   :  { %v32_v6 = vpop.permute.xlu1 %31  ;;  %v17_v7 = vpop.permute.xlu0 %16 }
  0x7e   :  { %v28_v12 = vmul.f32 %v112_v10, %v17_v7 }
  0x80   :  { %v38_v19 = vadd.f32 %v32_v6, %v28_v12 }
  0x81   :  { %v36_v8 = vpop.permute.xlu1 %35  ;;  %v22_v9 = vpop.permute.xlu0 %21 }
  0x82   :  { %v29_v13 = vmul.f32 %v112_v10, %v22_v9 }
  0x84   :  { %v39_v20 = vadd.f32 %v36_v8, %v29_v13 }
  0x86   :  { %v47_v14 = vpop.permute.xlu1 %46  ;;  %v43_v15 = vpop.permute.xlu0 %42 }
  0x87   :  { %v54_v16 = vmul.f32 %v113_v11, %v47_v14  ;;  %v53_v17 = vmul.f32 %v113_v11, %v43_v15 }
  0x89   :  { %v56_v23 = vadd.f32 %v54_v16, %v39_v20  ;;  %v55_v24 = vadd.f32 %v53_v17, %v38_v19 }
  0x8b   :  { %v60_v21 = vpop.permute.xlu1 %59  ;;  %v64_v22 = vpop.permute.xlu0 %63 }
  0x8c   :  { %v70_v25 = vmul.f32 %v114_v18, %v60_v21  ;;  %v71_v26 = vmul.f32 %v114_v18, %v64_v22 }
  0x8e   :  { %v72_v27 = vadd.f32 %v70_v25, %v55_v24  ;;  %v73_v28 = vadd.f32 %v71_v26, %v56_v23 }
  0x90   :  { %v75_v29 = vsel %vm74_vm0, %v72_v27, -inf  ;;  %v77_v30 = vsel %vm76_vm1, %v73_v28, -inf }
  0x91   :  { %v78_v31 = vmax.f32 %v75_v29, %v77_v30 }
  0x93   :  { %v79_v32 = vrot.slane %v78_v31, 4 }
  0x95   :  { %v80_v33 = vmax.f32 %v78_v31, %v79_v32 }
  0x97   :  { %v81_v34 = vrot.slane %v80_v33, 2 }
  0x99   :  { %v82_v35 = vmax.f32 %v80_v33, %v81_v34 }
  0x9b   :  { %v83_v36 = vrot.slane %v82_v35, 1 }
  0x9d   :  { %v84_v37 = vmax.f32 %v82_v35, %v83_v36 }
  0x9f   :  { %v85_v38 = vsub.f32 %v72_v27, %v84_v37  ;;  %v86_v39 = vsub.f32 %v73_v28, %v84_v37 }
  0xa1   :  { %v87_v40 = vmul.f32 1.442695, %v85_v38  ;;  %v89_v41 = vmul.f32 1.442695, %v86_v39 }
  0xa3   :  { %125 = vpow2.f32 %v87_v40 }
  0xa4   :  { %127 = vpow2.f32 %v89_v41 }
  0xb0   :  { %v126_v42 = vpop.eup %125 }
  0xb1   :  { %v128_v43 = vpop.eup %127  ;;  %v91_v44 = vsel %vm74_vm0, %v126_v42, 0.0 }
  0xb2   :  { %v92_v45 = vsel %vm76_vm1, %v128_v43, 0.0 }
  0xb3   :  { %v93_v46 = vadd.f32 %v92_v45, %v91_v44 }
  0xb5   :  { %v94_v47 = vrot.slane %v93_v46, 4 }
  0xb7   :  { %v95_v48 = vadd.f32 %v94_v47, %v93_v46 }
  0xb9   :  { %v96_v49 = vrot.slane %v95_v48, 2 }
  0xbb   :  { %v97_v50 = vadd.f32 %v96_v49, %v95_v48 }
  0xbd   :  { %v98_v51 = vrot.slane %v97_v50, 1 }
  0xbf   :  { %v99_v52 = vadd.f32 %v98_v51, %v97_v50 }
  0xc1   :  { %129 = vrcp.f32 %v99_v52 }
  0xce   :  { %v130_v53 = vpop.eup %129 }
  0xcf   :  { %v101_v54 = vmul.f32 %v130_v53, %v99_v52 }
  0xd1   :  { %v102_v55 = vsub.f32 2.0, %v101_v54 }
  0xd3   :  { %v103_v56 = vmul.f32 %v130_v53, %v102_v55 }
  0xd5   :  { %v104_v57 = vmul.f32 %v126_v42, %v103_v56  ;;  %v105_v58 = vmul.f32 %v128_v43, %v103_v56 }
  0xd7   :  { %106 = vst.msk [vmem:[%s179_s2] sm:$0xff] %vm74_vm0, %v104_v57 }
  0xd8   :  { %107 = vst.msk [vmem:[%s179_s2 + $0x8] sm:$0x3] %vm76_vm1, %v105_v58 }

</bundles_post_ra>
